<compile_context>
chip_gen: v5e
topology: v5e:2x2
jax: 0.10.0
libtpu: 0.0.40
codegen_flags: <defaults>
</compile_context>

<pallas_src>
from functools import partial

import jax
import jax.numpy as jnp
from jax.experimental import pallas as pl
from jax.experimental.pallas import tpu as pltpu


# ----------------------------- tiling helpers ------------------------------------

_VMEM_BUDGET = 24 * 1024 * 1024   # target for double-buffered in+out pipeline buffers
_VMEM_LIMIT = 48 * 1024 * 1024    # scoped VMEM limit (safe on v5e/v6e/v7x)
_LANE_MIN = 128                   # feature axis must be lane-dense to use Pallas


def _row_tile(m, d, itemsize, target=1024):
    """Row (sublane) tile: multiple of 8, VMEM-budgeted, <= target (or full extent)."""
    cap = _VMEM_BUDGET // (4 * max(int(d), 1) * max(int(itemsize), 1))
    tm = max(8, min(target, (cap // 8) * 8))
    if tm >= m:
        return m
    return tm


def _col_tile(n, d, itemsize, target=512):
    """Lane tile: multiple of 128, VMEM-budgeted, <= target (or full extent)."""
    cap = _VMEM_BUDGET // (4 * max(int(d), 1) * max(int(itemsize), 1))
    tl = max(128, min(target, (cap // 128) * 128))
    if tl >= n:
        return n
    return tl


def _itemsize(x):
    return jnp.dtype(x.dtype).itemsize


# ----------------------------- Pallas kernels ------------------------------------

def _layernorm_kernel(x_ref, g_ref, b_ref, o_ref, *, eps):
    # x: (TM, D) — normalize each row over D (single pass, rsqrt on EUP).
    x = x_ref[...].astype(jnp.float32)
    inv_d = 1.0 / x.shape[-1]
    s1 = jnp.sum(x, axis=-1, keepdims=True)
    s2 = jnp.sum(x * x, axis=-1, keepdims=True)
    mean = s1 * inv_d
    var = jnp.maximum(s2 * inv_d - mean * mean, 0.0)
    inv = jax.lax.rsqrt(var + eps)
    o_ref[...] = ((x - mean) * inv * g_ref[...] + b_ref[...]).astype(o_ref.dtype)


def pallas_layernorm(x2d, gamma, beta, eps=1e-5):
    # x2d: (M, D) rows (batch folded into rows), gamma/beta: (D,)
    M, D = x2d.shape
    TM = _row_tile(M, D, _itemsize(x2d))
    return pl.pallas_call(
        partial(_layernorm_kernel, eps=eps),
        out_shape=jax.ShapeDtypeStruct((M, D), x2d.dtype),
        grid=(pl.cdiv(M, TM),),
        in_specs=[pl.BlockSpec((TM, D), lambda i: (i, 0)),
                  pl.BlockSpec((1, D), lambda i: (0, 0)),
                  pl.BlockSpec((1, D), lambda i: (0, 0))],
        out_specs=pl.BlockSpec((TM, D), lambda i: (i, 0)),
        compiler_params=pltpu.CompilerParams(
            dimension_semantics=("parallel",),
            vmem_limit_bytes=_VMEM_LIMIT),
    )(x2d,
      gamma.astype(jnp.float32).reshape(1, D),
      beta.astype(jnp.float32).reshape(1, D))


def _transposed_ln_kernel(x_ref, s_ref, m_ref, o_ref):
    # x: (D, TL) — per column l: std/mean over D (torch.std_mean, unbiased=False,
    # no eps), y = s / std * (x - mean + m).  Columns are independent, so cdiv
    # tails (garbage columns, masked stores) are safe.
    x = x_ref[...].astype(jnp.float32)
    inv_d = 1.0 / x.shape[0]
    s1 = jnp.sum(x, axis=0, keepdims=True)              # (1, TL)
    s2 = jnp.sum(x * x, axis=0, keepdims=True)
    mean = s1 * inv_d
    var = jnp.maximum(s2 * inv_d - mean * mean, 0.0)
    inv = jax.lax.rsqrt(var)                            # matches torch: no eps
    o_ref[...] = (s_ref[0, 0] * inv * (x - mean + m_ref[0, 0])).astype(o_ref.dtype)


def pallas_transposed_ln(x, s, m):
    # x: (B, D, L) channels-first; s, m: (1, 1) scalar params.
    B, D, L = x.shape
    TL = _col_tile(L, D, _itemsize(x))
    return pl.pallas_call(
        _transposed_ln_kernel,
        out_shape=jax.ShapeDtypeStruct((B, D, L), x.dtype),
        grid=(B, pl.cdiv(L, TL)),
        in_specs=[pl.BlockSpec((pl.Squeezed(), D, TL), lambda b, j: (b, 0, j)),
                  pl.BlockSpec((1, 1), lambda b, j: (0, 0)),
                  pl.BlockSpec((1, 1), lambda b, j: (0, 0))],
        out_specs=pl.BlockSpec((pl.Squeezed(), D, TL), lambda b, j: (b, 0, j)),
        compiler_params=pltpu.CompilerParams(
            dimension_semantics=("parallel", "parallel"),
            vmem_limit_bytes=_VMEM_LIMIT),
    )(x, s.astype(jnp.float32), m.astype(jnp.float32))


def _channel_stats_kernel(x_ref, o_ref, *, L, TL, has_tail):
    # Per-sample, per-channel [sum, sumsq] over L, accumulated across L tiles (P3).
    j = pl.program_id(1)
    x = x_ref[...].astype(jnp.float32)                  # (TL, D)

    @pl.when(j == 0)
    def _():
        o_ref[...] = jnp.zeros_like(o_ref)

    def _acc(xv):
        s1 = jnp.sum(xv, axis=0, keepdims=True)
        s2 = jnp.sum(xv * xv, axis=0, keepdims=True)
        o_ref[...] += jnp.concatenate([s1, s2], axis=0)  # (2, D)

    if has_tail:
        full = (j + 1) * TL <= L

        @pl.when(full)
        def _():
            _acc(x)

        @pl.when(jnp.logical_not(full))
        def _():
            rows = jax.lax.broadcasted_iota(jnp.int32, x.shape, 0) + j * TL
            _acc(jnp.where(rows < L, x, 0.0))
    else:
        _acc(x)


def _persample_channel_stats(x):
    # x: (B, L, D) -> (B, 2, D) f32 partial sums [sum, sumsq] over L.
    B, L, D = x.shape
    TL = _row_tile(L, D, _itemsize(x))
    n_l = pl.cdiv(L, TL)
    has_tail = (n_l * TL) != L
    return pl.pallas_call(
        partial(_channel_stats_kernel, L=L, TL=TL, has_tail=has_tail),
        out_shape=jax.ShapeDtypeStruct((B, 2, D), jnp.float32),
        grid=(B, n_l),
        in_specs=[pl.BlockSpec((pl.Squeezed(), TL, D), lambda b, j: (b, j, 0))],
        out_specs=pl.BlockSpec((pl.Squeezed(), 2, D), lambda b, j: (b, 0, 0)),
        compiler_params=pltpu.CompilerParams(
            dimension_semantics=("parallel", "arbitrary"),
            vmem_limit_bytes=_VMEM_LIMIT),
    )(x)


def _scale_shift_kernel(x_ref, a_ref, b_ref, o_ref):
    # y = x * a + b   (a, b precomputed per-channel, f32; output in x.dtype)
    o_ref[...] = (x_ref[...].astype(jnp.float32) * a_ref[...] + b_ref[...]).astype(o_ref.dtype)


def _persample_scale_shift(x, a, b):
    # x: (B, L, D), a/b: (B, 1, D) f32 per-sample per-channel coefficients.
    B, L, D = x.shape
    TL = _row_tile(L, D, _itemsize(x))
    return pl.pallas_call(
        _scale_shift_kernel,
        out_shape=jax.ShapeDtypeStruct((B, L, D), x.dtype),
        grid=(B, pl.cdiv(L, TL)),
        in_specs=[pl.BlockSpec((pl.Squeezed(), TL, D), lambda bi, j: (bi, j, 0)),
                  pl.BlockSpec((pl.Squeezed(), 1, D), lambda bi, j: (bi, 0, 0)),
                  pl.BlockSpec((pl.Squeezed(), 1, D), lambda bi, j: (bi, 0, 0))],
        out_specs=pl.BlockSpec((pl.Squeezed(), TL, D), lambda bi, j: (bi, j, 0)),
        compiler_params=pltpu.CompilerParams(
            dimension_semantics=("parallel", "parallel"),
            vmem_limit_bytes=_VMEM_LIMIT),
    )(x, a, b)


def pallas_groupnorm1(x, gamma, beta, eps=1e-5):
    # GroupNorm(1, d): normalize over (L, D) per sample, per-channel affine.
    B, L, D = x.shape
    sums = _persample_channel_stats(x)                   # (B, 2, D)
    n = L * D
    s1 = jnp.sum(sums[:, 0, :], axis=-1)                 # (B,)
    s2 = jnp.sum(sums[:, 1, :], axis=-1)
    mean = s1 / n
    var = jnp.maximum(s2 / n - mean * mean, 0.0)
    inv = jax.lax.rsqrt(var + eps)                       # (B,)
    g = gamma.astype(jnp.float32)[None, :]               # (1, D)
    bt = beta.astype(jnp.float32)[None, :]
    a = inv[:, None] * g                                 # (B, D)
    b = bt - mean[:, None] * a
    return _persample_scale_shift(x, a[:, None, :], b[:, None, :])


def pallas_instancenorm(x, eps=1e-5):
    # InstanceNorm1d (affine=False): normalize each channel over L per sample.
    B, L, D = x.shape
    sums = _persample_channel_stats(x)                   # (B, 2, D)
    mean = sums[:, 0, :] / L                             # (B, D)
    var = jnp.maximum(sums[:, 1, :] / L - mean * mean, 0.0)
    inv = jax.lax.rsqrt(var + eps)
    a = inv
    b = -mean * inv
    return _persample_scale_shift(x, a[:, None, :], b[:, None, :])


def _bn_stats_kernel(x_ref, o_ref, *, M, TM, bpc, has_tail):
    # Grid-reduction accumulator: per-channel [sum, sumsq] over rows, one partial
    # result per leading ('parallel') grid slot; only the tail block pays the mask.
    c = pl.program_id(0)
    j = pl.program_id(1)
    x = x_ref[...].astype(jnp.float32)                   # (TM, D)

    @pl.when(j == 0)
    def _():
        o_ref[...] = jnp.zeros_like(o_ref)

    def _acc(xv):
        s1 = jnp.sum(xv, axis=0, keepdims=True)
        s2 = jnp.sum(xv * xv, axis=0, keepdims=True)
        o_ref[...] += jnp.concatenate([s1, s2], axis=0)  # (2, D)

    if has_tail:
        blk = c * bpc + j
        full = (blk + 1) * TM <= M

        @pl.when(full)
        def _():
            _acc(x)

        @pl.when(jnp.logical_not(full))
        def _():
            rows = jax.lax.broadcasted_iota(jnp.int32, x.shape, 0) + blk * TM
            _acc(jnp.where(rows < M, x, 0.0))
    else:
        _acc(x)


def pallas_batchnorm(x, gamma, beta, eps=1e-5):
    # Training-mode BatchNorm1d: batch statistics over (B, L) per channel.
    # TODO(synk): running_mean/running_var updates (track_running_stats) are module
    # state, not part of this functional forward output.
    B, L, D = x.shape
    M = B * L
    x2 = x.reshape(M, D)
    TM = _row_tile(M, D, _itemsize(x))
    n_blocks = pl.cdiv(M, TM)
    NC = 2 if n_blocks >= 2 else 1                       # split stats across TCs (v7x)
    bpc = pl.cdiv(n_blocks, NC)
    has_tail = (NC * bpc * TM) != M
    last_blk = n_blocks - 1

    sums = pl.pallas_call(
        partial(_bn_stats_kernel, M=M, TM=TM, bpc=bpc, has_tail=has_tail),
        out_shape=jax.ShapeDtypeStruct((NC, 2, D), jnp.float32),
        grid=(NC, bpc),
        in_specs=[pl.BlockSpec(
            (TM, D),
            lambda c, j: (jnp.minimum(c * bpc + j, last_blk), 0))],
        out_specs=pl.BlockSpec((pl.Squeezed(), 2, D), lambda c, j: (c, 0, 0)),
        compiler_params=pltpu.CompilerParams(
            dimension_semantics=("parallel", "arbitrary"),
            vmem_limit_bytes=_VMEM_LIMIT),
    )(x2)

    tot = jnp.sum(sums, axis=0)                          # (2, D)
    mean = tot[0] / M
    var = jnp.maximum(tot[1] / M - mean * mean, 0.0)
    inv = jax.lax.rsqrt(var + eps)
    a = gamma.astype(jnp.float32) * inv
    b = beta.astype(jnp.float32) - mean * a

    y2 = pl.pallas_call(
        _scale_shift_kernel,
        out_shape=jax.ShapeDtypeStruct((M, D), x.dtype),
        grid=(n_blocks,),
        in_specs=[pl.BlockSpec((TM, D), lambda i: (i, 0)),
                  pl.BlockSpec((1, D), lambda i: (0, 0)),
                  pl.BlockSpec((1, D), lambda i: (0, 0))],
        out_specs=pl.BlockSpec((TM, D), lambda i: (i, 0)),
        compiler_params=pltpu.CompilerParams(
            dimension_semantics=("parallel",),
            vmem_limit_bytes=_VMEM_LIMIT),
    )(x2, a.reshape(1, D), b.reshape(1, D))
    return y2.reshape(B, L, D)


# ----------------------------- small-D XLA fallback -------------------------------

def _xla_channels_last_norm(xc, name, gamma, beta, eps=1e-5):
    # D < 128: lane-sparse masked stores would cap Pallas at D/128 of HBM BW;
    # plain XLA fusion is faster.  (TODO(synk): pack 128//D rows per vreg row
    # with segmented lane reductions to keep this on the Pallas path.)
    xf = xc.astype(jnp.float32)
    if name == 'layer':
        mean = xf.mean(-1, keepdims=True)
        var = xf.var(-1, keepdims=True)
        y = (xf - mean) * jax.lax.rsqrt(var + eps) * gamma + beta
    elif name == 'group':
        mean = xf.mean((1, 2), keepdims=True)
        var = xf.var((1, 2), keepdims=True)
        y = (xf - mean) * jax.lax.rsqrt(var + eps) * gamma + beta
    elif name == 'instance':
        mean = xf.mean(1, keepdims=True)
        var = xf.var(1, keepdims=True)
        y = (xf - mean) * jax.lax.rsqrt(var + eps)
    elif name == 'batch':
        mean = xf.mean((0, 1), keepdims=True)
        var = xf.var((0, 1), keepdims=True)
        y = (xf - mean) * jax.lax.rsqrt(var + eps) * gamma + beta
    else:
        raise NotImplementedError(name)
    return y.astype(xc.dtype)


# ----------------------------- Normalization module (glue) ------------------------

def normalization_apply(p, x):
    """Forward pass of Normalization(d, transposed, _name_)."""
    name, transposed = p['name'], p['transposed']
    shape = x.shape
    if name == 'none':
        return x

    if transposed:
        xr = x.reshape(shape[0], shape[1], -1)           # 'b d ... -> b d (...)'
    else:
        xr = x.reshape(shape[0], -1, shape[-1])          # 'b ... d -> b (...) d'

    if name == 'layer' and transposed:
        y = pallas_transposed_ln(xr, p['s'], p['m'])
        return y.reshape(shape)

    # channels-last view for the remaining flavours
    xc = xr if not transposed else jnp.swapaxes(xr, 1, 2)   # (B, L, D)
    B, L, D = xc.shape

    if D < _LANE_MIN:
        y = _xla_channels_last_norm(xc, name, p.get('weight'), p.get('bias'))
    elif name == 'layer':
        y = pallas_layernorm(xc.reshape(B * L, D), p['weight'], p['bias']).reshape(B, L, D)
    elif name == 'group':
        y = pallas_groupnorm1(xc, p['weight'], p['bias'])
    elif name == 'instance':
        y = pallas_instancenorm(xc)
    elif name == 'batch':
        y = pallas_batchnorm(xc, p['weight'], p['bias'])
    else:
        raise NotImplementedError(name)

    if transposed:
        y = jnp.swapaxes(y, 1, 2)
    return y.reshape(shape)


# ----------------------------- pure-JAX reference ----------------------------------

def ref_normalization_apply(p, x, eps=1e-5):
    name, transposed = p['name'], p['transposed']
    shape = x.shape
    if name == 'none':
        return x
    x = x.astype(jnp.float32)
    if transposed:
        xr = x.reshape(shape[0], shape[1], -1)
    else:
        xr = x.reshape(shape[0], -1, shape[-1])

    if name == 'layer':
        if transposed:
            mean = xr.mean(1, keepdims=True)
            var = ((xr - mean) ** 2).mean(1, keepdims=True)
            y = p['s'] / jnp.sqrt(var) * (xr - mean + p['m'])
        else:
            mean = xr.mean(-1, keepdims=True)
            var = ((xr - mean) ** 2).mean(-1, keepdims=True)
            y = (xr - mean) / jnp.sqrt(var + eps) * p['weight'] + p['bias']
    else:
        xc = xr if not transposed else jnp.swapaxes(xr, 1, 2)   # (B, L, D)
        if name == 'group':
            mean = xc.mean((1, 2), keepdims=True)
            var = ((xc - mean) ** 2).mean((1, 2), keepdims=True)
            y = (xc - mean) / jnp.sqrt(var + eps) * p['weight'] + p['bias']
        elif name == 'instance':
            mean = xc.mean(1, keepdims=True)
            var = ((xc - mean) ** 2).mean(1, keepdims=True)
            y = (xc - mean) / jnp.sqrt(var + eps)
        elif name == 'batch':
            mean = xc.mean((0, 1), keepdims=True)
            var = ((xc - mean) ** 2).mean((0, 1), keepdims=True)
            y = (xc - mean) / jnp.sqrt(var + eps) * p['weight'] + p['bias']
        else:
            raise NotImplementedError(name)
        if transposed:
            y = jnp.swapaxes(y, 1, 2)
    return y.reshape(shape)


# ----------------------------- main -------------------------------------------------

if __name__ == "__main__":
    B, D = 2, 128            # lane-dense feature axis for the Pallas paths
    S1, S2 = 4, 8            # extra spatial axes for channels-last input -> L = 32
    L = 256                  # sequence length for channels-first (transposed) input

    key = jax.random.PRNGKey(0)
    kx1, kx2, kx3, kw, kb, ks, km = jax.random.split(key, 7)

    x_cl = jax.random.normal(kx1, (B, S1, S2, D), jnp.float32)       # 'b ... d'
    x_cf = jax.random.normal(kx2, (B, D, L), jnp.float32)            # 'b d ...'
    x_cl_bf16 = x_cl.astype(jnp.bfloat16)                            # dtype-preserving path
    x_small = jax.random.normal(kx3, (B, 16, 32), jnp.float32)       # D<128 -> XLA fallback

    w = 1.0 + 0.1 * jax.random.normal(kw, (D,), jnp.float32)         # per-channel gamma
    b = 0.1 * jax.random.normal(kb, (D,), jnp.float32)               # per-channel beta
    s = 1.0 + 0.1 * jax.random.normal(ks, (1, 1), jnp.float32)       # TransposedLN scalar scale
    m = 0.1 * jax.random.normal(km, (1, 1), jnp.float32)             # TransposedLN scalar shift

    configs = [
        ('layer',    False, x_cl,      {'weight': w, 'bias': b}),
        ('layer',    True,  x_cf,      {'s': s, 'm': m}),
        ('group',    False, x_cl,      {'weight': w, 'bias': b}),
        ('group',    True,  x_cf,      {'weight': w, 'bias': b}),
        ('instance', False, x_cl,      {}),
        ('batch',    False, x_cl,      {'weight': w, 'bias': b}),
        ('none',     False, x_cl,      {}),
        ('layer',    False, x_cl_bf16, {'weight': w, 'bias': b}),    # bf16 in -> bf16 out
        ('instance', False, x_small,   {}),                          # small-D fallback
    ]

    for name, transposed, x, extra in configs:
        p = {'name': name, 'transposed': transposed, **extra}
        out = jax.block_until_ready(normalization_apply(p, x))
        ref = ref_normalization_apply(p, x)
        tol = 2e-2 if x.dtype == jnp.bfloat16 else 2e-4
        assert out.shape == x.shape, (name, out.shape, x.shape)
        assert out.dtype == x.dtype, (name, out.dtype, x.dtype)
        outf = out.astype(jnp.float32)
        assert bool(jnp.all(jnp.isfinite(outf))), name
        assert bool(jnp.allclose(outf, ref, atol=tol, rtol=tol)), name

    print("KERNEL_OK")
</pallas_src>

<mosaic_0001>
module attributes {stable_mosaic.version = 11 : i64} {
  func.func @_layernorm_kernel(%arg0: i32, %arg1: memref<64x128xf32, #tpu.memory_space<vmem>>, %arg2: memref<1x128xf32, #tpu.memory_space<vmem>>, %arg3: memref<1x128xf32, #tpu.memory_space<vmem>>, %arg4: memref<64x128xf32, #tpu.memory_space<vmem>>) attributes {dimension_semantics = [#tpu.dimension_semantics<parallel>], iteration_bounds = array<i64: 1>, scalar_prefetch = 0 : i64, scratch_operands = 0 : i64, tpu.core_type = #tpu.core_type<tc>, window_params = [{transform_indices = @transform_0, window_bounds = array<i64: 64, 128>}, {pipeline_mode = #tpu.pipeline_mode<synchronous>, transform_indices = @transform_1, window_bounds = array<i64: 1, 128>}, {pipeline_mode = #tpu.pipeline_mode<synchronous>, transform_indices = @transform_2, window_bounds = array<i64: 1, 128>}, {transform_indices = @transform_3, window_bounds = array<i64: 64, 128>}]} {
    %c0 = arith.constant 0 : index
    %c0_0 = arith.constant 0 : index
    %0 = vector.load %arg1[%c0, %c0_0] : memref<64x128xf32, #tpu.memory_space<vmem>>, vector<64x128xf32>
    %cst = arith.constant dense<0.000000e+00> : vector<64xf32>
    %1 = vector.multi_reduction <add>, %0, %cst [1] : vector<64x128xf32> to vector<64xf32>
    %2 = vector.shape_cast %1 : vector<64xf32> to vector<64x1xf32>
    %3 = arith.mulf %0, %0 : vector<64x128xf32>
    %cst_1 = arith.constant dense<0.000000e+00> : vector<64xf32>
    %4 = vector.multi_reduction <add>, %3, %cst_1 [1] : vector<64x128xf32> to vector<64xf32>
    %5 = vector.shape_cast %4 : vector<64xf32> to vector<64x1xf32>
    %cst_2 = arith.constant 7.812500e-03 : f32
    %6 = vector.broadcast %cst_2 : f32 to vector<64x1xf32>
    %7 = arith.mulf %2, %6 : vector<64x1xf32>
    %cst_3 = arith.constant 7.812500e-03 : f32
    %8 = vector.broadcast %cst_3 : f32 to vector<64x1xf32>
    %9 = arith.mulf %5, %8 : vector<64x1xf32>
    %10 = arith.mulf %7, %7 : vector<64x1xf32>
    %11 = arith.subf %9, %10 : vector<64x1xf32>
    %cst_4 = arith.constant 0.000000e+00 : f32
    %12 = vector.broadcast %cst_4 : f32 to vector<64x1xf32>
    %13 = arith.maximumf %11, %12 : vector<64x1xf32>
    %cst_5 = arith.constant 9.99999974E-6 : f32
    %14 = vector.broadcast %cst_5 : f32 to vector<64x1xf32>
    %15 = arith.addf %13, %14 : vector<64x1xf32>
    %16 = math.rsqrt %15 : vector<64x1xf32>
    %17 = vector.broadcast %7 : vector<64x1xf32> to vector<64x128xf32>
    %18 = arith.subf %0, %17 : vector<64x128xf32>
    %19 = vector.broadcast %16 : vector<64x1xf32> to vector<64x128xf32>
    %20 = arith.mulf %18, %19 : vector<64x128xf32>
    %c0_6 = arith.constant 0 : index
    %c0_7 = arith.constant 0 : index
    %21 = vector.load %arg2[%c0_6, %c0_7] : memref<1x128xf32, #tpu.memory_space<vmem>>, vector<1x128xf32>
    %22 = vector.broadcast %21 : vector<1x128xf32> to vector<64x128xf32>
    %23 = arith.mulf %20, %22 : vector<64x128xf32>
    %c0_8 = arith.constant 0 : index
    %c0_9 = arith.constant 0 : index
    %24 = vector.load %arg3[%c0_8, %c0_9] : memref<1x128xf32, #tpu.memory_space<vmem>>, vector<1x128xf32>
    %25 = vector.broadcast %24 : vector<1x128xf32> to vector<64x128xf32>
    %26 = arith.addf %23, %25 : vector<64x128xf32>
    %c0_10 = arith.constant 0 : index
    %c0_11 = arith.constant 0 : index
    %27 = vector.load %arg4[%c0_10, %c0_11] : memref<64x128xf32, #tpu.memory_space<vmem>>, vector<64x128xf32>
    tpu.vector_store %arg4[%c0_10, %c0_11], %26 {strides = array<i32>} : memref<64x128xf32, #tpu.memory_space<vmem>>, vector<64x128xf32>,
    return
  }
  func.func @transform_0(%arg0: i32) -> (i32, i32) {
    %c0_i32 = arith.constant 0 : i32
    %c0_i32_0 = arith.constant 0 : i32
    return %arg0, %c0_i32 : i32, i32
  }
  func.func @transform_1(%arg0: i32) -> (i32, i32) {
    %c0_i32 = arith.constant 0 : i32
    %c0_i32_0 = arith.constant 0 : i32
    %c0_i32_1 = arith.constant 0 : i32
    return %c0_i32, %c0_i32_0 : i32, i32
  }
  func.func @transform_2(%arg0: i32) -> (i32, i32) {
    %c0_i32 = arith.constant 0 : i32
    %c0_i32_0 = arith.constant 0 : i32
    %c0_i32_1 = arith.constant 0 : i32
    return %c0_i32, %c0_i32_0 : i32, i32
  }
  func.func @transform_3(%arg0: i32) -> (i32, i32) {
    %c0_i32 = arith.constant 0 : i32
    %c0_i32_0 = arith.constant 0 : i32
    return %arg0, %c0_i32 : i32, i32
  }
}

</mosaic_0001>

<bundles_post_ra>
// kernel: tpu_custom_call.1
= control target key start
LH: loop header
LB: loop body
LE: loop exit
PB: predicated region body
PF: predicated region fallthrough
CT: control target
= control target key end

     0   :  { %8 = vsyncpa [#allocation3], 0  ;;  %s583_s0 = inlined_call_operand.hbm [shape: f32[64,128], index: 0, kind: input, shape index: {}]   ;;  %s584_s1 = inlined_call_operand.hbm [shape: f32[1,128], index: 1, kind: input, shape index: {}]   ;;  %s585_s2 = inlined_call_operand.vmem [shape: f32[1,128], index: 2, kind: input, shape index: {}]   ;;  %s586_s3 = inlined_call_operand.hbm [shape: f32[64,128], index: 3, kind: output, shape index: {}]  }
   0x1   :  { %9 = vsyncpa [#allocation6], 0 }
   0x2   :  { %10 = vsyncpa [#allocation4], 0  ;;  %s15_s14 = sshll.u32 %s583_s0, 4  ;;  %s390_s15 = smov [#allocation2]   ;;  %s16_s14 = int_to_ptr.hbm [resolvable:$true] %s15_s14 }
   0x3   :  { %s17_s16 = sshll.u32 %s390_s15, 4  ;;  %s29_s19 = sshll.u32 %s584_s1, 4  ;;  %s18_s16 = int_to_ptr.vmem [resolvable:$true] %s17_s16  ;;  %s30_s19 = int_to_ptr.hbm [resolvable:$true] %s29_s19 }
   0x4   :  { %s391_s20 = smov 128   ;;  %s392_s21 = smov 8  }
   0x5   :  { %23 = dma.hbm_to_vmem [thread:$0]  %s16_s14, 1024, %s18_s16, [#allocation3], %s391_s20, %s391_s20, %s392_s21  }
   0x6   :  { %s393_s22 = smov [#allocation5]  }
   0x7   :  { %s31_s23 = sshll.u32 %s393_s22, 4  ;;  %s32_s23 = int_to_ptr.vmem [resolvable:$true] %s31_s23 }
   0x8   :  { %34 = dma.hbm_to_vmem [thread:$0]  %s30_s19, 16, %s32_s23, [#allocation6]  }
   0x9   :  { %384 = dma.done.wait [#allocation3], 1024  }
   0xa   :  { %385 = vsyncadd [#allocation3], 4294966272 }
   0xb   :  { %386 = dma.done.wait [#allocation6], 16  }
   0xc   :  { %387 = vsyncadd [#allocation6], 4294967280  ;;  %v424_v0 = vld [vmem:[#allocation2 + $0x20] sm:$0xff]  ;;  %v426_v1 = vld [vmem:[#allocation2 + $0x10] sm:$0xff]  ;;  %s275_s27 = sshll.u32 %s586_s3, 4  ;;  %s276_s27 = int_to_ptr.hbm [resolvable:$true] %s275_s27 }
   0xd   :  { %v428_v2 = vld [vmem:[#allocation2] sm:$0xff]  ;;  %61 = vadd.xlane.f32.xlu2 %v424_v0  ;;  %57 = vadd.xlane.f32.xlu1 %v426_v1  ;;  %v433_v3 = vld [vmem:[#allocation2 + $0x28] sm:$0xff]  ;;  %v435_v4 = vld [vmem:[#allocation2 + $0x18] sm:$0xff]  ;;  %v71_v9 = vmul.f32 %v426_v1, %v426_v1  ;;  %v73_v14 = vmul.f32 %v424_v0, %v424_v0 }
   0xe   :  { %53 = vadd.xlane.f32.xlu0 %v428_v2  ;;  %v437_v5 = vld [vmem:[#allocation2 + $0x8] sm:$0xff]  ;;  %v69_v6 = vmul.f32 %v428_v2, %v428_v2  ;;  %v444_v7 = vld [vmem:[#allocation2 + $0x38] sm:$0xff]  ;;  %v446_v8 = vld [vmem:[#allocation2 + $0x30] sm:$0xff]  ;;  %v72_v10 = vmul.f32 %v435_v4, %v435_v4  ;;  %v74_v12 = vmul.f32 %v433_v3, %v433_v3 }
   0xf   :  { %v70_v11 = vmul.f32 %v437_v5, %v437_v5  ;;  %v75_v13 = vmul.f32 %v446_v8, %v446_v8  ;;  %v76_v15 = vmul.f32 %v444_v7, %v444_v7 }
  0x15   :  { %63 = vadd.xlane.f32.xlu2 %v433_v3  ;;  %59 = vadd.xlane.f32.xlu1 %v435_v4 }
  0x16   :  { %55 = vadd.xlane.f32.xlu0 %v437_v5 }
  0x1d   :  { %67 = vadd.xlane.f32.xlu1 %v444_v7  ;;  %77 = vadd.xlane.f32.xlu2 %v69_v6 }
  0x1e   :  { %65 = vadd.xlane.f32.xlu0 %v446_v8 }
  0x25   :  { %81 = vadd.xlane.f32.xlu1 %v71_v9  ;;  %83 = vadd.xlane.f32.xlu2 %v72_v10 }
  0x26   :  { %79 = vadd.xlane.f32.xlu0 %v70_v11 }
  0x2d   :  { %87 = vadd.xlane.f32.xlu1 %v74_v12  ;;  %89 = vadd.xlane.f32.xlu2 %v75_v13 }
  0x2e   :  { %85 = vadd.xlane.f32.xlu0 %v73_v14 }
  0x36   :  { %91 = vadd.xlane.f32.xlu0 %v76_v15 }
  0x80   :  { %v62_v16 = vpop.xlane.xlu2 %61  ;;  %v58_v17 = vpop.xlane.xlu1 %57 }
  0x81   :  { %v54_v18 = vpop.xlane.xlu0 %53  ;;  %v470_v29 = vmul.f32 0.0078125, %v58_v17  ;;  %v484_v49 = vmul.f32 0.0078125, %v62_v16 }
  0x82   :  { %v464_v22 = vmul.f32 0.0078125, %v54_v18 }
  0x83   :  { %v111_v34 = vmul.f32 %v470_v29, %v470_v29  ;;  %v113_v62 = vmul.f32 %v484_v49, %v484_v49 }
  0x84   :  { %v109_v25 = vmul.f32 %v464_v22, %v464_v22 }
  0x88   :  { %v64_v19 = vpop.xlane.xlu2 %63  ;;  %v60_v20 = vpop.xlane.xlu1 %59 }
  0x89   :  { %v56_v21 = vpop.xlane.xlu0 %55  ;;  %v472_v30 = vmul.f32 0.0078125, %v60_v20  ;;  %v482_v46 = vmul.f32 0.0078125, %v64_v19 }
  0x8a   :  { %v474_v32 = vmul.f32 0.0078125, %v56_v21 }
  0x8b   :  { %v112_v37 = vmul.f32 %v472_v30, %v472_v30  ;;  %v114_v59 = vmul.f32 %v482_v46, %v482_v46 }
  0x8c   :  { %v110_v41 = vmul.f32 %v474_v32, %v474_v32 }
  0x90   :  { %v466_v23 = vpop.xlane.xlu1 %67  ;;  %v78_v24 = vpop.xlane.xlu2 %77 }
  0x91   :  { %v66_v26 = vpop.xlane.xlu0 %65  ;;  %v101_v27 = vmul.f32 0.0078125, %v78_v24 }
  0x92   :  { %v486_v52 = vmul.f32 0.0078125, %v66_v26 }
  0x93   :  { %v117_v28 = vsub.f32 %v101_v27, %v109_v25 }
  0x94   :  { %v115_v9 = vmul.f32 %v486_v52, %v486_v52 }
  0x95   :  { %v125_v31 = vmax.f32 %v117_v28, 0.0  ;;  %v221_v28 = vsub.f32 %v428_v2, %v464_v22  ;;  %v222_v2 = vsub.f32 %v437_v5, %v474_v32  ;;  %v525_v22 = vld [vmem:[%s585_s2] ss:$0 sm:$0xff]  ;;  %s394_s2 = smov [#allocation7]  }
  0x96   :  { %s273_s24 = sshll.u32 %s394_s2, 4  ;;  %s274_s24 = int_to_ptr.vmem [resolvable:$true] %s273_s24 }
  0x97   :  { %v133_v33 = vadd.f32 1e-05, %v125_v31  ;;  %v511_v31 = vmul.f32 0.0078125, %v466_v23 }
  0x98   :  { %v82_v35 = vpop.xlane.xlu1 %81  ;;  %v84_v36 = vpop.xlane.xlu2 %83 }
  0x99   :  { %296 = vrsqrt.f32 %v133_v33  ;;  %v103_v38 = vmul.f32 0.0078125, %v82_v35  ;;  %v80_v39 = vpop.xlane.xlu0 %79  ;;  %v104_v40 = vmul.f32 0.0078125, %v84_v36  ;;  %vm147_vm1 = vweird.f32 %v133_v33 }
  0x9a   :  { %v102_v42 = vmul.f32 0.0078125, %v80_v39  ;;  %v223_v36 = vsub.f32 %v426_v1, %v470_v29  ;;  %v116_v29 = vmul.f32 %v511_v31, %v511_v31 }
  0x9b   :  { %v119_v43 = vsub.f32 %v103_v38, %v111_v34  ;;  %v120_v44 = vsub.f32 %v104_v40, %v112_v37  ;;  %v513_v34 = vld [vmem:[#allocation5] ss:$0 sm:$0xff] }
  0x9c   :  { %v118_v45 = vsub.f32 %v102_v42, %v110_v41 }
  0x9d   :  { %v127_v47 = vmax.f32 %v119_v43, 0.0  ;;  %v128_v48 = vmax.f32 %v120_v44, 0.0 }
  0x9e   :  { %v126_v50 = vmax.f32 %v118_v45, 0.0 }
  0x9f   :  { %v297_v51 = vpop.eup %296  ;;  %v488_v53 = vadd.f32 1e-05, %v127_v47  ;;  %v490_v54 = vadd.f32 1e-05, %v128_v48 }
  0xa0   :  { %v142_v55 = vmul.f32 %v297_v51, %v133_v33  ;;  %v492_v56 = vadd.f32 1e-05, %v126_v50  ;;  %v88_v57 = vpop.xlane.xlu1 %87  ;;  %v90_v58 = vpop.xlane.xlu2 %89  ;;  %vm148_vm0 = vweird.f32 %v297_v51 }
  0xa1   :  { %298 = vrsqrt.f32 %v488_v53  ;;  %v106_v60 = vmul.f32 0.0078125, %v88_v57  ;;  %v86_v61 = vpop.xlane.xlu0 %85  ;;  %v107_v11 = vmul.f32 0.0078125, %v90_v58  ;;  %vm149_vm2 = vmor %vm147_vm1, %vm148_vm0  ;;  %vm167_vm3 = vweird.f32 %v488_v53 }
  0xa2   :  { %v143_v63 = vmul.f32 %v297_v51, %v142_v55  ;;  %300 = vrsqrt.f32 %v492_v56  ;;  %v105_v6 = vmul.f32 0.0078125, %v86_v61  ;;  %vm157_vm8 = vweird.f32 %v492_v56 }
  0xa3   :  { %302 = vrsqrt.f32 %v490_v54  ;;  %v122_v10 = vsub.f32 %v106_v60, %v114_v59  ;;  %v123_v15 = vsub.f32 %v107_v11, %v115_v9  ;;  %vm177_vm9 = vweird.f32 %v490_v54 }
  0xa4   :  { %v144_v12 = vmul.f32 0.5, %v143_v63  ;;  %v121_v13 = vsub.f32 %v105_v6, %v113_v62 }
  0xa5   :  { %v130_v14 = vmax.f32 %v122_v10, 0.0  ;;  %v131_v26 = vmax.f32 %v123_v15, 0.0  ;;  %v224_v10 = vsub.f32 %v435_v4, %v472_v30 }
  0xa6   :  { %v145_v16 = vsub.f32 1.5, %v144_v12  ;;  %v129_v17 = vmax.f32 %v121_v13, 0.0 }
  0xa7   :  { %v299_v18 = vpop.eup %298  ;;  %v503_v19 = vadd.f32 1e-05, %v130_v14  ;;  %v528_v43 = vadd.f32 1e-05, %v131_v26 }
  0xa8   :  { %v301_v20 = vpop.eup %300  ;;  %v146_v21 = vmul.f32 %v297_v51, %v145_v16  ;;  %v162_v24 = vmul.f32 %v299_v18, %v488_v53  ;;  %v506_v25 = vadd.f32 1e-05, %v129_v17  ;;  %vm168_vm4 = vweird.f32 %v299_v18 }
  0xa9   :  { %v303_v27 = vpop.eup %302  ;;  %v152_v33 = vmul.f32 %v301_v20, %v492_v56  ;;  %304 = vrsqrt.f32 %v503_v19  ;;  %v92_v35 = vpop.xlane.xlu0 %91  ;;  %vm158_vm5 = vweird.f32 %v301_v20  ;;  %vm169_vm7 = vmor %vm167_vm3, %vm168_vm4  ;;  %vm197_vm13 = vweird.f32 %v503_v19 }
  0xaa   :  { %v150_v37 = vsel %vm149_vm2, %v297_v51, %v146_v21  ;;  %v163_v38 = vmul.f32 %v299_v18, %v162_v24  ;;  %v172_v39 = vmul.f32 %v303_v27, %v490_v54  ;;  %306 = vrsqrt.f32 %v506_v25  ;;  %vm159_vm10 = vmor %vm157_vm8, %vm158_vm5 }
  0xab   :  { %v229_v23 = vmul.f32 %v221_v28, %v150_v37  ;;  %v153_v40 = vmul.f32 %v301_v20, %v152_v33  ;;  %v108_v1 = vmul.f32 0.0078125, %v92_v35  ;;  %308 = vrsqrt.f32 %v528_v43 }
  0xac   :  { %v164_v41 = vmul.f32 0.5, %v163_v38  ;;  %v173_v42 = vmul.f32 %v303_v27, %v172_v39  ;;  %vm178_vm6 = vweird.f32 %v303_v27  ;;  %v226_v35 = vsub.f32 %v433_v3, %v482_v46 }
  0xad   :  { %v241_v44 = vmul.f32 %v513_v34, %v229_v23  ;;  %v154_v5 = vmul.f32 0.5, %v153_v40  ;;  %v124_v51 = vsub.f32 %v108_v1, %v116_v29  ;;  %vm179_vm11 = vmor %vm177_vm9, %vm178_vm6  ;;  %vm187_vm0 = vweird.f32 %v506_v25 }
  0xae   :  { %v165_v32 = vsub.f32 1.5, %v164_v41  ;;  %v174_v45 = vmul.f32 0.5, %v173_v42  ;;  %vm207_vm3 = vweird.f32 %v528_v43 }
  0xaf   :  { %v305_v47 = vpop.eup %304  ;;  %v253_v48 = vadd.f32 %v525_v22, %v241_v44  ;;  %v155_v50 = vsub.f32 1.5, %v154_v5  ;;  %v132_v61 = vmax.f32 %v124_v51, 0.0 }
  0xb0   :  { %v166_v55 = vmul.f32 %v299_v18, %v165_v32  ;;  %v175_v57 = vsub.f32 1.5, %v174_v45  ;;  %v192_v58 = vmul.f32 %v305_v47, %v503_v19  ;;  %v307_v59 = vpop.eup %306  ;;  %vm198_vm12 = vweird.f32 %v305_v47 }
  0xb1   :  { %261 = vst [vmem:[#allocation7] sm:$0xff] %v253_v48  ;;  %v156_v60 = vmul.f32 %v301_v20, %v155_v50  ;;  %v182_v9 = vmul.f32 %v307_v59, %v506_v25  ;;  %v545_v53 = vadd.f32 1e-05, %v132_v61  ;;  %v309_v13 = vpop.eup %308  ;;  %vm188_vm14 = vweird.f32 %v307_v59  ;;  %vm199_vm15 = vmor %vm197_vm13, %vm198_vm12 }
  0xb2   :  { %v170_v62 = vsel %vm169_vm7, %v299_v18, %v166_v55  ;;  %v176_v63 = vmul.f32 %v303_v27, %v175_v57  ;;  %v193_v6 = vmul.f32 %v305_v47, %v192_v58  ;;  %v202_v18 = vmul.f32 %v309_v13, %v528_v43  ;;  %vm189_vm1 = vmor %vm187_vm0, %vm188_vm14 }
  0xb3   :  { %v231_v11 = vmul.f32 %v223_v36, %v170_v62  ;;  %v160_v12 = vsel %vm159_vm10, %v301_v20, %v156_v60  ;;  %v183_v15 = vmul.f32 %v307_v59, %v182_v9  ;;  %310 = vrsqrt.f32 %v545_v53 }
  0xb4   :  { %v230_v56 = vmul.f32 %v222_v2, %v160_v12  ;;  %v180_v14 = vsel %vm179_vm11, %v303_v27, %v176_v63  ;;  %v194_v54 = vmul.f32 0.5, %v193_v6  ;;  %v203_v26 = vmul.f32 %v309_v13, %v202_v18 }
  0xb5   :  { %v243_v16 = vmul.f32 %v513_v34, %v231_v11  ;;  %v232_v17 = vmul.f32 %v224_v10, %v180_v14  ;;  %v184_v30 = vmul.f32 0.5, %v183_v15  ;;  %v225_v19 = vsub.f32 %v424_v0, %v484_v49 }
  0xb6   :  { %v242_v21 = vmul.f32 %v513_v34, %v230_v56  ;;  %v195_v4 = vsub.f32 1.5, %v194_v54  ;;  %v204_v37 = vmul.f32 0.5, %v203_v26  ;;  %vm208_vm2 = vweird.f32 %v309_v13 }
  0xb7   :  { %v255_v20 = vadd.f32 %v525_v22, %v243_v16  ;;  %v244_v24 = vmul.f32 %v513_v34, %v232_v17  ;;  %v185_v33 = vsub.f32 1.5, %v184_v30  ;;  %v227_v25 = vsub.f32 %v446_v8, %v486_v52  ;;  %vm209_vm4 = vmor %vm207_vm3, %vm208_vm2 }
  0xb8   :  { %v254_v27 = vadd.f32 %v525_v22, %v242_v21  ;;  %v196_v28 = vmul.f32 %v305_v47, %v195_v4  ;;  %v205_v23 = vsub.f32 1.5, %v204_v37  ;;  %vm217_vm6 = vweird.f32 %v545_v53 }
  0xb9   :  { %263 = vst [vmem:[#allocation7 + $0x10] sm:$0xff] %v255_v20  ;;  %v256_v36 = vadd.f32 %v525_v22, %v244_v24  ;;  %v186_v39 = vmul.f32 %v307_v59, %v185_v33  ;;  %v311_v3 = vpop.eup %310  ;;  %v228_v52 = vsub.f32 %v444_v7, %v511_v31 }
  0xba   :  { %262 = vst [vmem:[#allocation7 + $0x8] sm:$0xff] %v254_v27  ;;  %v200_v38 = vsel %vm199_vm15, %v305_v47, %v196_v28  ;;  %v206_v42 = vmul.f32 %v309_v13, %v205_v23  ;;  %v212_v1 = vmul.f32 %v311_v3, %v545_v53  ;;  %vm218_vm5 = vweird.f32 %v311_v3 }
  0xbb   :  { %264 = vst [vmem:[#allocation7 + $0x18] sm:$0xff] %v256_v36  ;;  %v234_v2 = vmul.f32 %v226_v35, %v200_v38  ;;  %v190_v46 = vsel %vm189_vm1, %v307_v59, %v186_v39  ;;  %vm219_vm7 = vmor %vm217_vm6, %vm218_vm5 }
  0xbc   :  { %v233_v41 = vmul.f32 %v225_v19, %v190_v46  ;;  %v210_v29 = vsel %vm209_vm4, %v309_v13, %v206_v42  ;;  %v213_v44 = vmul.f32 %v311_v3, %v212_v1 }
  0xbd   :  { %v246_v40 = vmul.f32 %v513_v34, %v234_v2  ;;  %v235_v5 = vmul.f32 %v227_v25, %v210_v29 }
  0xbe   :  { %v245_v49 = vmul.f32 %v513_v34, %v233_v41  ;;  %v214_v32 = vmul.f32 0.5, %v213_v44 }
  0xbf   :  { %v258_v0 = vadd.f32 %v525_v22, %v246_v40  ;;  %v247_v45 = vmul.f32 %v513_v34, %v235_v5 }
  0xc0   :  { %v257_v43 = vadd.f32 %v525_v22, %v245_v49  ;;  %v215_v47 = vsub.f32 1.5, %v214_v32 }
  0xc1   :  { %266 = vst [vmem:[#allocation7 + $0x28] sm:$0xff] %v258_v0  ;;  %v259_v48 = vadd.f32 %v525_v22, %v247_v45 }
  0xc2   :  { %265 = vst [vmem:[#allocation7 + $0x20] sm:$0xff] %v257_v43  ;;  %v216_v8 = vmul.f32 %v311_v3, %v215_v47 }
  0xc3   :  { %267 = vst [vmem:[#allocation7 + $0x30] sm:$0xff] %v259_v48 }
  0xc4   :  { %v220_v50 = vsel %vm219_vm7, %v311_v3, %v216_v8 }
  0xc5   :  { %v236_v51 = vmul.f32 %v228_v52, %v220_v50 }
  0xc7   :  { %v248_v55 = vmul.f32 %v513_v34, %v236_v51 }
  0xc9   :  { %v260_v57 = vadd.f32 %v525_v22, %v248_v55 }
  0xcb   :  { %268 = vst [vmem:[#allocation7 + $0x38] sm:$0xff] %v260_v57 }
  0xcc   :  { %281 = dma.vmem_to_hbm [thread:$0]  %s274_s24, 1024, %s276_s27, [#allocation4], %s391_s20, %s391_s20, %s392_s21  }
  0xcd   :  { %388 = dma.done.wait [#allocation4], 1024  }
  0xce   :  { %389 = vsyncadd [#allocation4], 4294966272 }
  0xcf   :  { %286 = vsyncpa [#allocation3], 1 }
  0xd0   :  { %287 = vsyncpa [#allocation6], 1 }
  0xd1   :  { %288 = vsyncpa [#allocation4], 1 }

</bundles_post_ra>
